<compile_context>
chip_gen: v7x
topology: tpu7x:2x2x1
jax: 0.10.0
libtpu: 0.0.40
codegen_flags: <defaults>
</compile_context>

<pallas_src>
import jax
import jax.numpy as jnp
from jax.experimental import pallas as pl
from jax.experimental.pallas import tpu as pltpu


MLP_SIZE = 32
NUM_HEADS = 32
BATCH = 8


def _network_kernel(x_ref, small_ref, big_ref, out_ref):
    # small_ref: (M+3, M)   rows [0:M]=w2, M=w1, M+1=b1, M+2=b2
    # big_ref:   (M+3, H*M) rows [0:M]=hw1 (col = n*H+h), M=hb1, M+1=hw2 row,
    #                       M+2=hb2 (first H lanes)
    B, H = out_ref.shape
    M = small_ref.shape[1]

    w2 = small_ref[0:M, :]              # (M, M)
    w1 = small_ref[M:M + 1, :]          # (1, M)
    b1 = small_ref[M + 1:M + 2, :]      # (1, M)
    b2 = small_ref[M + 2:M + 3, :]      # (1, M)

    hw1 = big_ref[0:M, :]               # (M, H*M)
    hb1 = big_ref[M:M + 1, :]           # (1, H*M)
    hw2 = big_ref[M + 1:M + 2, :]       # (1, H*M)
    hb2 = big_ref[M + 2:M + 3, 0:H]     # (1, H)

    # Backbone layer 1: Linear(1, M).  K == 1 -> VPU broadcast multiply.
    h = jnp.maximum(x_ref[...] * w1 + b1, 0.0)                        # (B, M)

    # Backbone layer 2: Linear(M, M) on the MXU.
    bb = jnp.dot(h, w2, preferred_element_type=jnp.float32) + b2
    bb = jnp.maximum(bb, 0.0)                                         # (B, M)

    # All H head first layers fused: (B, M) @ (M, H*M); columns are n-major.
    hh = jnp.dot(bb, hw1, preferred_element_type=jnp.float32) + hb1
    hh = jnp.maximum(hh, 0.0)                                         # (B, H*M)

    # Head output projections: VPU multiply + lane-fold reduction over n.
    r = hh * hw2                                                      # (B, H*M)
    width = r.shape[1]
    while width > H:                    # log2(M) contiguous halving adds
        half = width // 2
        r = r[:, :half] + r[:, half:width]
        width = half
    out_ref[...] = r + hb2                                            # (B, H)


def pack_params(params):
    """One-time packing of raw params into two lane-friendly f32 slabs."""
    w1, b1, w2, b2, hw1, hb1, hw2, hb2 = params
    M = w1.shape[1]
    H = hw1.shape[0]
    assert M & (M - 1) == 0, "mlp_size must be a power of two for the lane fold"

    # n-major column packing: column index = n*H + h.
    hw1_p = jnp.transpose(hw1, (1, 2, 0)).reshape(M, M * H)  # [m,n*H+h]=hw1[h,m,n]
    hb1_p = jnp.transpose(hb1, (1, 2, 0)).reshape(1, M * H)  # [0,n*H+h]=hb1[h,0,n]
    hw2_p = jnp.transpose(hw2, (1, 2, 0)).reshape(1, M * H)  # [0,n*H+h]=hw2[h,n,0]
    hb2_p = jnp.pad(hb2.reshape(1, H), ((0, 0), (0, M * H - H)))

    big = jnp.concatenate([hw1_p, hb1_p, hw2_p, hb2_p], axis=0)       # (M+3, H*M)
    small = jnp.concatenate([w2, w1, b1, b2], axis=0)                 # (M+3, M)
    return small.astype(jnp.float32), big.astype(jnp.float32)


@jax.jit
def network_forward(x, packed):
    """x: (B, 1) f32.  Returns (H, B, 1) f32 = stacked ensemble head outputs."""
    small, big = packed
    B = x.shape[0]
    M = small.shape[1]
    H = big.shape[1] // M

    flops = 2 * B * M * M + 2 * B * M * (M * H) + 4 * B * M * H + 4 * B * M
    bytes_accessed = 4 * (x.size + small.size + big.size + B * H)

    out_bh = pl.pallas_call(
        _network_kernel,
        out_shape=jax.ShapeDtypeStruct((B, H), jnp.float32),
        in_specs=[
            pl.BlockSpec(memory_space=pltpu.MemorySpace.VMEM),
            pl.BlockSpec(memory_space=pltpu.MemorySpace.VMEM),
            pl.BlockSpec(memory_space=pltpu.MemorySpace.VMEM),
        ],
        out_specs=pl.BlockSpec(memory_space=pltpu.MemorySpace.VMEM),
        cost_estimate=pl.CostEstimate(
            flops=flops, transcendentals=0, bytes_accessed=bytes_accessed),
    )(x, small, big)

    # (B, H) -> (H, B, 1), matching the PyTorch list of H (B, 1) tensors.
    # Fuses into the same jitted executable -> no extra dispatch.
    return jnp.transpose(out_bh)[..., None]


def init_params(key, mlp_size=MLP_SIZE, num_heads=NUM_HEADS):
    ks = jax.random.split(key, 8)
    scale = 0.1
    w1 = scale * jax.random.normal(ks[0], (1, mlp_size), jnp.float32)
    b1 = scale * jax.random.normal(ks[1], (1, mlp_size), jnp.float32)
    w2 = scale * jax.random.normal(ks[2], (mlp_size, mlp_size), jnp.float32)
    b2 = scale * jax.random.normal(ks[3], (1, mlp_size), jnp.float32)
    hw1 = scale * jax.random.normal(ks[4], (num_heads, mlp_size, mlp_size),
                                    jnp.float32)
    hb1 = scale * jax.random.normal(ks[5], (num_heads, 1, mlp_size),
                                    jnp.float32)
    hw2 = scale * jax.random.normal(ks[6], (num_heads, mlp_size, 1),
                                    jnp.float32)
    hb2 = scale * jax.random.normal(ks[7], (num_heads, 1, 1), jnp.float32)
    return (w1, b1, w2, b2, hw1, hb1, hw2, hb2)


def network_forward_ref(x, params):
    (w1, b1, w2, b2, hw1, hb1, hw2, hb2) = params
    h = jnp.maximum(x @ w1 + b1, 0.0)
    bb = jnp.maximum(h @ w2 + b2, 0.0)                    # (B, M)
    hh = jnp.maximum(jnp.einsum('bm,hmn->hbn', bb, hw1) + hb1, 0.0)
    return jnp.einsum('hbm,hmo->hbo', hh, hw2) + hb2      # (H, B, 1)


if __name__ == "__main__":
    key = jax.random.PRNGKey(0)
    k_in, k_p = jax.random.split(key)
    x = jax.random.normal(k_in, (BATCH, 1), jnp.float32)

    params = init_params(k_p)
    packed = pack_params(params)        # one-time packing, cached across calls
    packed = jax.block_until_ready(packed)

    out = network_forward(x, packed)
    out = jax.block_until_ready(out)

    ref = network_forward_ref(x, params)
    assert out.shape == (NUM_HEADS, BATCH, 1)
    assert jnp.allclose(out, ref, atol=1e-5, rtol=1e-5)

    print("KERNEL_OK")
</pallas_src>

<mosaic_0001>
module attributes {stable_mosaic.version = 11 : i64} {
  func.func @_network_kernel(%arg0: memref<8x1xf32, #tpu.memory_space<vmem>>, %arg1: memref<35x32xf32, #tpu.memory_space<vmem>>, %arg2: memref<35x1024xf32, #tpu.memory_space<vmem>>, %arg3: memref<8x32xf32, #tpu.memory_space<vmem>>) attributes {dimension_semantics = [], scalar_prefetch = 0 : i64, scratch_operands = 0 : i64, tpu.core_type = #tpu.core_type<tc>} {
    %c0 = arith.constant 0 : index
    %c0_0 = arith.constant 0 : index
    %0 = vector.load %arg1[%c0, %c0_0] : memref<35x32xf32, #tpu.memory_space<vmem>>, vector<32x32xf32>
    %c32 = arith.constant 32 : index
    %c0_1 = arith.constant 0 : index
    %1 = vector.load %arg1[%c32, %c0_1] : memref<35x32xf32, #tpu.memory_space<vmem>>, vector<1x32xf32>
    %c33 = arith.constant 33 : index
    %c0_2 = arith.constant 0 : index
    %2 = vector.load %arg1[%c33, %c0_2] : memref<35x32xf32, #tpu.memory_space<vmem>>, vector<1x32xf32>
    %c34 = arith.constant 34 : index
    %c0_3 = arith.constant 0 : index
    %3 = vector.load %arg1[%c34, %c0_3] : memref<35x32xf32, #tpu.memory_space<vmem>>, vector<1x32xf32>
    %c0_4 = arith.constant 0 : index
    %c0_5 = arith.constant 0 : index
    %4 = vector.load %arg2[%c0_4, %c0_5] : memref<35x1024xf32, #tpu.memory_space<vmem>>, vector<32x1024xf32>
    %c32_6 = arith.constant 32 : index
    %c0_7 = arith.constant 0 : index
    %5 = vector.load %arg2[%c32_6, %c0_7] : memref<35x1024xf32, #tpu.memory_space<vmem>>, vector<1x1024xf32>
    %c33_8 = arith.constant 33 : index
    %c0_9 = arith.constant 0 : index
    %6 = vector.load %arg2[%c33_8, %c0_9] : memref<35x1024xf32, #tpu.memory_space<vmem>>, vector<1x1024xf32>
    %c34_10 = arith.constant 34 : index
    %c0_11 = arith.constant 0 : index
    %7 = vector.load %arg2[%c34_10, %c0_11] : memref<35x1024xf32, #tpu.memory_space<vmem>>, vector<1x32xf32>
    %c0_12 = arith.constant 0 : index
    %c0_13 = arith.constant 0 : index
    %8 = vector.load %arg0[%c0_12, %c0_13] : memref<8x1xf32, #tpu.memory_space<vmem>>, vector<8x1xf32>
    %9 = vector.broadcast %8 : vector<8x1xf32> to vector<8x32xf32>
    %10 = vector.broadcast %1 : vector<1x32xf32> to vector<8x32xf32>
    %11 = arith.mulf %9, %10 : vector<8x32xf32>
    %12 = vector.broadcast %2 : vector<1x32xf32> to vector<8x32xf32>
    %13 = arith.addf %11, %12 : vector<8x32xf32>
    %cst = arith.constant 0.000000e+00 : f32
    %14 = vector.broadcast %cst : f32 to vector<8x32xf32>
    %15 = arith.maximumf %13, %14 : vector<8x32xf32>
    %cst_14 = arith.constant dense<0.000000e+00> : vector<8x32xf32>
    %16 = tpu.matmul %15, %0, %cst_14 {dimension_numbers = #tpu.dot_dimension_numbers<[1], [0], [0], [1], [0, 0, 1, 1], [], []>} : vector<8x32xf32>, vector<32x32xf32>, vector<8x32xf32> -> vector<8x32xf32>
    %17 = vector.broadcast %3 : vector<1x32xf32> to vector<8x32xf32>
    %18 = arith.addf %16, %17 : vector<8x32xf32>
    %cst_15 = arith.constant 0.000000e+00 : f32
    %19 = vector.broadcast %cst_15 : f32 to vector<8x32xf32>
    %20 = arith.maximumf %18, %19 : vector<8x32xf32>
    %cst_16 = arith.constant dense<0.000000e+00> : vector<8x1024xf32>
    %21 = tpu.matmul %20, %4, %cst_16 {dimension_numbers = #tpu.dot_dimension_numbers<[1], [0], [0], [1], [0, 0, 1, 1], [], []>} : vector<8x32xf32>, vector<32x1024xf32>, vector<8x1024xf32> -> vector<8x1024xf32>
    %22 = vector.broadcast %5 : vector<1x1024xf32> to vector<8x1024xf32>
    %23 = arith.addf %21, %22 : vector<8x1024xf32>
    %cst_17 = arith.constant 0.000000e+00 : f32
    %24 = vector.broadcast %cst_17 : f32 to vector<8x1024xf32>
    %25 = arith.maximumf %23, %24 : vector<8x1024xf32>
    %26 = vector.broadcast %6 : vector<1x1024xf32> to vector<8x1024xf32>
    %27 = arith.mulf %25, %26 : vector<8x1024xf32>
    %28 = vector.extract_strided_slice %27 {offsets = [0, 0], sizes = [8, 512], strides = [1, 1]} : vector<8x1024xf32> to vector<8x512xf32>
    %29 = vector.extract_strided_slice %27 {offsets = [0, 512], sizes = [8, 512], strides = [1, 1]} : vector<8x1024xf32> to vector<8x512xf32>
    %30 = arith.addf %28, %29 : vector<8x512xf32>
    %31 = vector.extract_strided_slice %30 {offsets = [0, 0], sizes = [8, 256], strides = [1, 1]} : vector<8x512xf32> to vector<8x256xf32>
    %32 = vector.extract_strided_slice %30 {offsets = [0, 256], sizes = [8, 256], strides = [1, 1]} : vector<8x512xf32> to vector<8x256xf32>
    %33 = arith.addf %31, %32 : vector<8x256xf32>
    %34 = vector.extract_strided_slice %33 {offsets = [0, 0], sizes = [8, 128], strides = [1, 1]} : vector<8x256xf32> to vector<8x128xf32>
    %35 = vector.extract_strided_slice %33 {offsets = [0, 128], sizes = [8, 128], strides = [1, 1]} : vector<8x256xf32> to vector<8x128xf32>
    %36 = arith.addf %34, %35 : vector<8x128xf32>
    %37 = vector.extract_strided_slice %36 {offsets = [0, 0], sizes = [8, 64], strides = [1, 1]} : vector<8x128xf32> to vector<8x64xf32>
    %38 = vector.extract_strided_slice %36 {offsets = [0, 64], sizes = [8, 64], strides = [1, 1]} : vector<8x128xf32> to vector<8x64xf32>
    %39 = arith.addf %37, %38 : vector<8x64xf32>
    %40 = vector.extract_strided_slice %39 {offsets = [0, 0], sizes = [8, 32], strides = [1, 1]} : vector<8x64xf32> to vector<8x32xf32>
    %41 = vector.extract_strided_slice %39 {offsets = [0, 32], sizes = [8, 32], strides = [1, 1]} : vector<8x64xf32> to vector<8x32xf32>
    %42 = arith.addf %40, %41 : vector<8x32xf32>
    %43 = vector.broadcast %7 : vector<1x32xf32> to vector<8x32xf32>
    %44 = arith.addf %42, %43 : vector<8x32xf32>
    %c0_18 = arith.constant 0 : index
    %c0_19 = arith.constant 0 : index
    %45 = vector.load %arg3[%c0_18, %c0_19] : memref<8x32xf32, #tpu.memory_space<vmem>>, vector<8x32xf32>
    tpu.vector_store %arg3[%c0_18, %c0_19], %44 {strides = array<i32>} : memref<8x32xf32, #tpu.memory_space<vmem>>, vector<8x32xf32>,
    return
  }
}

</mosaic_0001>

<bundles_post_ra>
// kernel: network_forward.1
= control target key start
LH: loop header
LB: loop body
LE: loop exit
PB: predicated region body
PF: predicated region fallthrough
CT: control target
= control target key end

     0   :  { %8 = vsyncpa [#allocation3], 0  ;;  %s802_s0 = inlined_call_operand.vmem [shape: f32[8,1], index: 0, kind: input, shape index: {}]   ;;  %s803_s1 = inlined_call_operand.vmem [shape: f32[35,32], index: 1, kind: input, shape index: {}]   ;;  %s804_s2 = inlined_call_operand.hbm [shape: f32[35,1024], index: 2, kind: input, shape index: {}]   ;;  %s805_s3 = inlined_call_operand.hbm [shape: f32[8,32], index: 3, kind: output, shape index: {}]  }
   0x1   :  { %9 = vsyncpa [#allocation4], 0  ;;  %s712_s12 = smov [#allocation2]   ;;  %s664_s16 = scalar_lea.hbm %s804_s2, 5120 }
   0x2   :  { %s19_s13 = sshll.u32 %s712_s12, 4  ;;  %p665_p0 = scmp.ne.s32.totalorder %s804_s2, %s664_s16  ;;  %s20_s13 = int_to_ptr.vmem [resolvable:$true] %s19_s13 }
   0x3   :  { %p668_p1 = scmp.lt.u32.totalorder %s664_s16, %s804_s2 }
   0x5   :  { %p670_p2 = pnand %p668_p1, %p665_p0 }
   0x7   :  { %673 = shalt.err (!%p670_p2)
}
   0x8   :  { %s674_s21 = scalar_lea.vmem %s20_s13, 5120  ;;  %p679_p4 = scmp.lt.s32.totalorder %s20_s13, %s20_s13 }
   0x9   :  { %p675_p3 = scmp.ne.s32.totalorder %s20_s13, %s674_s21  ;;  %p680_p5 = scmp.lt.s32.totalorder %s674_s21, %s674_s21 }
   0xb   :  { %p681_p6 = por %p680_p5, %p679_p4 }
   0xd   :  { %p682_p7 = pnand %p681_p6, %p675_p3 }
   0xf   :  { %685 = shalt.err (!%p682_p7)
}
  0x10   :  { %s713_s22 = smov 1024   ;;  %s714_s23 = smov 64  }
  0x11   :  { %25 = dma.hbm_to_vmem [thread:$0]  %s804_s2, 5120, %s20_s13, [#allocation3], %s713_s22, %s713_s22, %s714_s23  }
  0x12   :  { %708 = dma.done.wait [#allocation3], 5120  }
  0x13   :  { %709 = vsyncadd [#allocation3], 4294962176  ;;  %v715_v0 = vmov 0   ;;  %v716_v1 = vmov 0.0|0.0   ;;  %v77_v2 = vld [vmem:[%s802_s0] sm:$0xff]  ;;  %v30_v4 = vld [vmem:[%s803_s1 + $0x8] sm:$0xff] }
  0x14   :  { %663 = vset.pattern.permute.xlu0 %v715_v0  ;;  %616 = vmatprep.subr.bf16.mxu0 %v716_v1  ;;  %v29_v3 = vld [vmem:[%s803_s1] sm:$0xff]  ;;  %v31_v5 = vld [vmem:[%s803_s1 + $0x10] sm:$0xff]  ;;  %v32_v7 = vld [vmem:[%s803_s1 + $0x18] sm:$0xff]  ;;  %vm717_vm0 = vmmov 0   ;;  %v718_v9 = vmov 0.0   ;;  %vm98_vm1 = vcmask 261120  }
  0x15   :  { %80 = vperm.xlu0 %663, %v77_v2   ;;  %v617_v6 = vpack.c.bf16 %v30_v4, %v29_v3  ;;  %v620_v8 = vpack.c.bf16 %v32_v7, %v31_v5  ;;  %613 = vmatprep.mubr.msk.f32.mxu0 %vm717_vm0, %v718_v9  ;;  %v37_v10 = vld [vmem:[#allocation2 + $0x8] sm:$0xff]  ;;  %v39_v12 = vld [vmem:[#allocation2 + $0x18] sm:$0xff]  ;;  %v36_v15 = vld [vmem:[#allocation2] sm:$0xff]  ;;  %v174_v5 = vlaneseq  ;;  %s720_s13 = smov [#allocation5]  }
  0x16   :  { %281 = vmatprep.mubr.f32.mxu1 %v718_v9  ;;  %v45_v11 = vld [vmem:[#allocation2 + $0x48] sm:$0xff]  ;;  %v47_v14 = vld [vmem:[#allocation2 + $0x58] sm:$0xff]  ;;  %v44_v16 = vld [vmem:[#allocation2 + $0x40] sm:$0xff]  ;;  %s583_s14 = sshll.u32 %s720_s13, 4  ;;  %s584_s14 = int_to_ptr.vmem [resolvable:$true] %s583_s14 }
  0x17   :  { %618 = vmatpush3.bf16.msra.mxu0 %v617_v6  ;;  %v622_v13 = vpack.c.bf16 %v45_v11, %v37_v10  ;;  %v630_v17 = vpack.c.bf16 %v47_v14, %v39_v12  ;;  %v624_v18 = vpack.c.bf16 %v44_v16, %v36_v15  ;;  %v592_v19 = vld [vmem:[%s803_s1 + $0x20] ss:$0 sm:$0xff]  ;;  %v593_v21 = vld [vmem:[%s803_s1 + $0x21] ss:$0 sm:$0xff]  ;;  %v38_v23 = vld [vmem:[#allocation2 + $0x10] sm:$0xff]  ;;  %v175_v6 = vshrl.u32 %v174_v5, 7  ;;  %p691_p9 = scmp.lt.s32.totalorder %s584_s14, %s584_s14 }
  0x18   :  { %619 = vmatprep.subr.bf16.mxu0 %v716_v1  ;;  %v46_v24 = vld [vmem:[#allocation2 + $0x50] sm:$0xff]  ;;  %v53_v28 = vld [vmem:[#allocation2 + $0x88] sm:$0xff]  ;;  %v55_v30 = vld [vmem:[#allocation2 + $0x98] sm:$0xff]  ;;  %s686_s15 = scalar_lea.vmem %s584_s14, 128 }
  0x19   :  { %623 = vmatprep.subr.bf16.mxu1 %v622_v13  ;;  %v632_v26 = vpack.c.bf16 %v46_v24, %v38_v23  ;;  %v61_v29 = vld [vmem:[#allocation2 + $0xc8] sm:$0xff]  ;;  %v63_v32 = vld [vmem:[#allocation2 + $0xd8] sm:$0xff]  ;;  %v52_v33 = vld [vmem:[#allocation2 + $0x80] sm:$0xff]  ;;  %v176_v11 = vsub.s32 0, %v175_v6  ;;  %v184_v12 = vsub.s32 2, %v175_v6  ;;  %v180_v13 = vsub.s32 1, %v175_v6  ;;  %p687_p8 = scmp.ne.s32.totalorder %s584_s14, %s686_s15  ;;  %p692_p10 = scmp.lt.s32.totalorder %s686_s15, %s686_s15 }
  0x1a   :  { %625 = vmatpush1.bf16.msra.mxu1 %v624_v18  ;;  %v626_v31 = vpack.c.bf16 %v61_v29, %v53_v28  ;;  %v60_v34 = vld [vmem:[#allocation2 + $0xc0] sm:$0xff]  ;;  %v634_v35 = vpack.c.bf16 %v63_v32, %v55_v30  ;;  %v54_v37 = vld [vmem:[#allocation2 + $0x90] sm:$0xff]  ;;  %v41_v40 = vld [vmem:[#allocation2 + $0x28] sm:$0xff]  ;;  %v188_v14 = vsub.s32 3, %v175_v6  ;;  %v200_v23 = vsub.s32 6, %v175_v6 }
  0x1b   :  { %621 = vmatpush3.bf16.msra.mxu0 %v620_v8  ;;  %v628_v36 = vpack.c.bf16 %v60_v34, %v52_v33  ;;  %v62_v38 = vld [vmem:[#allocation2 + $0xd0] sm:$0xff]  ;;  %v49_v41 = vld [vmem:[#allocation2 + $0x68] sm:$0xff]  ;;  %v43_v42 = vld [vmem:[#allocation2 + $0x38] sm:$0xff]  ;;  %p693_p11 = por %p692_p10, %p691_p9 }
  0x1c   :  { %631 = vmatprep.subr.bf16.mxu0 %v630_v17  ;;  %627 = vmatprep.subr.bf16.mxu1 %v626_v31  ;;  %v636_v39 = vpack.c.bf16 %v62_v38, %v54_v37  ;;  %v638_v43 = vpack.c.bf16 %v49_v41, %v41_v40  ;;  %v51_v44 = vld [vmem:[#allocation2 + $0x78] sm:$0xff]  ;;  %v594_v46 = vld [vmem:[%s803_s1 + $0x22] ss:$0 sm:$0xff]  ;;  %v42_v49 = vld [vmem:[#allocation2 + $0x30] sm:$0xff]  ;;  %s719_s1 = smov 96  }
  0x1d   :  { %v646_v45 = vpack.c.bf16 %v51_v44, %v43_v42  ;;  %v40_v47 = vld [vmem:[#allocation2 + $0x20] sm:$0xff]  ;;  %v50_v50 = vld [vmem:[#allocation2 + $0x70] sm:$0xff]  ;;  %v57_v51 = vld [vmem:[#allocation2 + $0xa8] sm:$0xff]  ;;  %p694_p12 = pnand %p693_p11, %p687_p8 }
  0x1e   :  { %629 = vmatpush1.bf16.msra.mxu1 %v628_v36  ;;  %v48_v48 = vld [vmem:[#allocation2 + $0x60] sm:$0xff]  ;;  %v65_v53 = vld [vmem:[#allocation2 + $0xe8] sm:$0xff]  ;;  %v59_v54 = vld [vmem:[#allocation2 + $0xb8] sm:$0xff]  ;;  %v648_v59 = vpack.c.bf16 %v50_v50, %v42_v49 }
  0x1f   :  { %639 = vmatprep.subr.bf16.mxu1 %v638_v43  ;;  %v67_v55 = vld [vmem:[#allocation2 + $0xf8] sm:$0xff]  ;;  %v640_v58 = vpack.c.bf16 %v48_v48, %v40_v47  ;;  %v56_v60 = vld [vmem:[#allocation2 + $0xa0] sm:$0xff]  ;;  %v642_v62 = vpack.c.bf16 %v65_v53, %v57_v51  ;;  %v58_v1 = vld [vmem:[#allocation2 + $0xb0] sm:$0xff] }
  0x20   :  { %v650_v63 = vpack.c.bf16 %v67_v55, %v59_v54  ;;  %v64_v0 = vld [vmem:[#allocation2 + $0xe0] sm:$0xff]  ;;  %v66_v2 = vld [vmem:[#allocation2 + $0xf0] sm:$0xff] }
  0x21   :  { %v644_v3 = vpack.c.bf16 %v64_v0, %v56_v60  ;;  %v652_v4 = vpack.c.bf16 %v66_v2, %v58_v1  ;;  %v69_v7 = vld [vmem:[#allocation2 + $0x100] ss:$8 sm:$0xf]  ;;  %v73_v15 = vld [vmem:[#allocation2 + $0x101] ss:$8 sm:$0xf] }
  0x22   :  { %v70_v8 = vld [vmem:[#allocation2 + $0x100] ss:$8 sm:$0xf0]  ;;  %v74_v16 = vld [vmem:[#allocation2 + $0x101] ss:$8 sm:$0xf0] }
  0x23   :  { %v71_v10 = vor.u32 %v70_v8, %v69_v7  ;;  %v75_v28 = vor.u32 %v74_v16, %v73_v15  ;;  %v76_v15 = vld [vmem:[#allocation2 + $0x102] ss:$0 sm:$0xff] }
  0x25   :  { %v181_v24 = vrot.slane %v71_v10, %v180_v13  ;;  %v201_v32 = vrot.slane %v71_v10, %v200_v23  ;;  %v513_v37 = vrot.slane %v75_v28, %v176_v11  ;;  %v521_v38 = vrot.slane %v75_v28, %v184_v12 }
  0x26   :  { %v525_v40 = vrot.slane %v75_v28, %v188_v14  ;;  %v537_v44 = vrot.slane %v75_v28, %v200_v23 }
  0x94   :  { %v81_v20 = vpop.permute.xlu0 %80 }
  0x95   :  { %v87_v22 = vmul.f32 %v592_v19, %v81_v20  ;;  %v185_v19 = vrot.slane %v71_v10, %v184_v12 }
  0x97   :  { %v92_v25 = vadd.f32 %v593_v21, %v87_v22  ;;  %v192_v22 = vsub.s32 4, %v175_v6 }
  0x99   :  { %v93_v27 = vmax.f32 %v92_v25, 0.0  ;;  %v189_v25 = vrot.slane %v71_v10, %v188_v14  ;;  %v193_v31 = vrot.slane %v71_v10, %v192_v22  ;;  %v529_v42 = vrot.slane %v75_v28, %v192_v22 }
  0x9b   :  { %614 = vmatmul.mubr.msk.f32.vlgmr.msra.gmra.mrb[0].mxu0 %vm98_vm1, %v93_v27  ;;  %v204_v27 = vsub.s32 7, %v175_v6 }
  0x9c   :  { %633 = vmatpush1.bf16.msra.mxu0 %v632_v26  ;;  %352 = vmatprep.mubr.f32.mxu0 %v718_v9  ;;  %v196_v26 = vsub.s32 5, %v175_v6 }
  0x9d   :  { %635 = vmatprep.subr.bf16.mxu0 %v634_v35  ;;  %v205_v36 = vrot.slane %v71_v10, %v204_v27 }
  0x9e   :  { %v197_v35 = vrot.slane %v71_v10, %v196_v26 }
  0xa0   :  { %637 = vmatpush1.bf16.msra.mxu0 %v636_v39  ;;  %v517_v39 = vrot.slane %v75_v28, %v180_v13 }
  0xa1   :  { %647 = vmatprep.subr.bf16.mxu0 %v646_v45  ;;  %v533_v45 = vrot.slane %v75_v28, %v196_v26 }
 0x16e   :  { %v168_v52 = vpop.f32.mrb[0].mxu0 }
 0x16f   :  { %v169_v56 = vadd.f32 %v594_v46, %v168_v52  ;;  %v615_v57 = vpop.f32.mrb[1].mxu0  ;;  %v541_v46 = vrot.slane %v75_v28, %v204_v27 }
 0x171   :  { %v172_v61 = vmax.f32 %v169_v56, 0.0 }
 0x173   :  { %596 = vmatmul.mubr.msk.f32.vlgmr.msra.gmra.mrb[0].mxu1 %vm98_vm1, %v172_v61  ;;  %597 = vmatmul.mubr.msk.f32.vlgmr.msra.gmra.mrb[2].mxu0 %vm98_vm1, %v172_v61 }
 0x174   :  { %641 = vmatpush1.bf16.msra.mxu1 %v640_v58  ;;  %649 = vmatpush1.bf16.msra.mxu0 %v648_v59 }
 0x175   :  { %643 = vmatprep.subr.bf16.mxu1 %v642_v62  ;;  %651 = vmatprep.subr.bf16.mxu0 %v650_v63 }
 0x176   :  { %423 = vmatprep.mubr.f32.mxu1 %v718_v9  ;;  %494 = vmatprep.mubr.f32.mxu0 %v718_v9  ;;  %v177_v9 = vrot.slane %v71_v10, %v176_v11 }
 0x178   :  { %645 = vmatpush1.bf16.msra.mxu1 %v644_v3  ;;  %653 = vmatpush1.bf16.msra.mxu0 %v652_v4 }
 0x17b   :  { %598 = vmatmul.mubr.msk.f32.vlgmr.msra.gmra.mrb[2].mxu1 %vm98_vm1, %v172_v61  ;;  %599 = vmatmul.mubr.msk.f32.vlgmr.msra.gmra.mrb[4].mxu0 %vm98_vm1, %v172_v61 }
 0x246   :  { %v283_v17 = vpop.f32.mrb[0].mxu1  ;;  %v354_v18 = vpop.f32.mrb[2].mxu0 }
 0x247   :  { %v285_v20 = vpop.f32.mrb[1].mxu1  ;;  %v356_v21 = vpop.f32.mrb[3].mxu0  ;;  %v284_v29 = vadd.f32 %v283_v17, %v177_v9  ;;  %v355_v30 = vadd.f32 %v354_v18, %v185_v19 }
 0x248   :  { %v286_v33 = vadd.f32 %v285_v20, %v181_v24  ;;  %v357_v34 = vadd.f32 %v356_v21, %v189_v25 }
 0x249   :  { %v501_v47 = vmax.f32 %v284_v29, 0.0  ;;  %v503_v48 = vmax.f32 %v355_v30, 0.0 }
 0x24a   :  { %v502_v53 = vmax.f32 %v286_v33, 0.0  ;;  %v504_v54 = vmax.f32 %v357_v34, 0.0 }
 0x24b   :  { %v550_v61 = vmul.f32 %v513_v37, %v501_v47  ;;  %v552_v62 = vmul.f32 %v521_v38, %v503_v48 }
 0x24c   :  { %v551_v1 = vmul.f32 %v517_v39, %v502_v53  ;;  %v553_v2 = vmul.f32 %v525_v40, %v504_v54 }
 0x24e   :  { %v425_v41 = vpop.f32.mrb[2].mxu1  ;;  %v496_v43 = vpop.f32.mrb[4].mxu0 }
 0x24f   :  { %v426_v49 = vadd.f32 %v425_v41, %v193_v31  ;;  %v497_v50 = vadd.f32 %v496_v43, %v201_v32  ;;  %v427_v51 = vpop.f32.mrb[3].mxu1  ;;  %v498_v52 = vpop.f32.mrb[5].mxu0 }
 0x250   :  { %v428_v55 = vadd.f32 %v427_v51, %v197_v35  ;;  %v499_v56 = vadd.f32 %v498_v52, %v205_v36 }
 0x251   :  { %v505_v57 = vmax.f32 %v426_v49, 0.0  ;;  %v507_v58 = vmax.f32 %v497_v50, 0.0 }
 0x252   :  { %v506_v59 = vmax.f32 %v428_v55, 0.0  ;;  %v508_v60 = vmax.f32 %v499_v56, 0.0 }
 0x253   :  { %v554_v63 = vmul.f32 %v529_v42, %v505_v57  ;;  %v556_v0 = vmul.f32 %v537_v44, %v507_v58 }
 0x254   :  { %v555_v3 = vmul.f32 %v533_v45, %v506_v59  ;;  %v557_v4 = vmul.f32 %v541_v46, %v508_v60 }
 0x255   :  { %v558_v5 = vadd.f32 %v554_v63, %v550_v61  ;;  %v560_v6 = vadd.f32 %v556_v0, %v552_v62 }
 0x256   :  { %v559_v7 = vadd.f32 %v555_v3, %v551_v1  ;;  %v561_v8 = vadd.f32 %v557_v4, %v553_v2 }
 0x257   :  { %v562_v10 = vadd.f32 %v560_v6, %v558_v5 }
 0x258   :  { %v563_v11 = vadd.f32 %v561_v8, %v559_v7 }
 0x25a   :  { %v564_v12 = vadd.f32 %v563_v11, %v562_v10 }
 0x25c   :  { %566 = vrot.lane.b32.xlu0 %v564_v12, %s714_s23 }
 0x2ce   :  { %v567_v13 = vpop.permute.xlu0 %566 }
 0x2cf   :  { %v569_v14 = vadd.f32 %v567_v13, %v564_v12 }
 0x2d1   :  { %571 = vrot.lane.b32.xlu1 %v569_v14, %s719_s1 }
 0x343   :  { %v572_v16 = vpop.permute.xlu1 %571 }
 0x344   :  { %v574_v17 = vadd.f32 %v572_v16, %v569_v14 }
 0x346   :  { %v575_v18 = vadd.f32 %v574_v17, %v76_v15 }
 0x348   :  { %576 = vst.msk [vmem:[#allocation5] sm:$0xff] %vm98_vm1, %v575_v18 }
 0x349   :  { %697 = shalt.err (!%p694_p12)
}
 0x34a   :  { %s698_s18 = scalar_lea.hbm %s805_s3, 128 }
 0x34b   :  { %p699_p13 = scmp.ne.s32.totalorder %s805_s3, %s698_s18  ;;  %p702_p0 = scmp.lt.u32.totalorder %s698_s18, %s805_s3 }
 0x34d   :  { %p704_p1 = pnand %p702_p0, %p699_p13 }
 0x34f   :  { %707 = shalt.err (!%p704_p1)
}
 0x350   :  { %586 = dma.vmem_to_hbm [thread:$0]  %s584_s14, 128, %s805_s3, [#allocation4]  }
 0x351   :  { %710 = dma.done.wait [#allocation4], 128  }
 0x352   :  { %711 = vsyncadd [#allocation4], 4294967168 }
 0x353   :  { %590 = vsyncpa [#allocation3], 1 }
 0x354   :  { %591 = vsyncpa [#allocation4], 1 }

</bundles_post_ra>
